<compile_context>
chip_gen: v7x
topology: tpu7x:2x2x1
jax: 0.10.0
libtpu: 0.0.40
codegen_flags: <defaults>
</compile_context>

<pallas_src>
import functools

import numpy as np
import jax
import jax.numpy as jnp
from jax import lax
from jax.experimental import pallas as pl
from jax.experimental.pallas import tpu as pltpu

LANE = 128   # lanes per vreg
SUB = 8      # sublanes per vreg == inner time-chunk height


def _round_up(x, m):
    return ((x + m - 1) // m) * m


def _cdiv(a, b):
    return (a + b - 1) // b


def _psp_kernel(x_ref, o_ref, carry_ref, hist_ref=None, *, duration, has_sub, pad):
    """One (TC, W) time x lane block.

    x_ref, o_ref : (TC, W) input/output tiles (time x flattened features).
    carry_ref    : (SUB, W) f32 scratch; row 0 holds the running cumsum carried across
                   time blocks (VMEM scratch persists across grid steps).
    hist_ref     : (pad + TC, W) f32 scratch (windowed path only); rows [0, pad) hold the
                   cumsum of the previous `pad` time steps, rows [pad, pad+TC) are written
                   with this block's cumsum and serve the cs[t-D] reads.
    """
    TC, W = x_ref.shape
    n_chunks = TC // SUB
    t_idx = pl.program_id(1)

    # ---- once per lane block: reset the carried state -----------------------------------
    @pl.when(t_idx == 0)
    def _init():
        carry_ref[...] = jnp.zeros_like(carry_ref)
        if has_sub:
            def zero_body(k, c):
                r = pl.multiple_of(k * SUB, SUB)
                hist_ref[pl.ds(r, SUB), :] = jnp.zeros((SUB, W), jnp.float32)
                return c
            lax.fori_loop(0, pad // SUB, zero_body, 0)

    # Hoisted loop-invariant sublane index (JAX does not CSE iota/broadcast in loops).
    # Compares against it are recomputed inline (3 cheap VPU ops per chunk) instead of
    # keeping three (SUB, W) masks live across the whole loop (vreg-pressure fix).
    row = lax.broadcasted_iota(jnp.int32, (SUB, W), 0)

    def body(c, carry):
        t0 = pl.multiple_of(c * SUB, SUB)
        xc = x_ref[pl.ds(t0, SUB), :].astype(jnp.float32)

        # Inclusive prefix sum over the 8 sublanes (Hillis-Steele; rolls go to the XLU).
        # TODO(synk): an (8, 8) lower-triangular matmul on the otherwise idle MXU would
        # drop the rolls/selects entirely if small-matmul lowering is acceptable.
        p = xc
        for s in (1, 2, 4):
            p = p + jnp.where(row >= s, pltpu.roll(p, s, axis=0), 0.0)

        csc = p + carry                       # (SUB, W) + (1, W) broadcast -> block cumsum

        if has_sub:
            base = pl.multiple_of(pad + t0, SUB)
            hist_ref[pl.ds(base, SUB), :] = csc
            start = base - duration           # >= 0 because pad >= duration
            if duration % SUB == 0:
                start = pl.multiple_of(start, SUB)
            # TODO(synk): for duration % 8 != 0, build `old` from two aligned loads plus a
            # pltpu.roll instead of relying on the unaligned-sublane window lowering.
            old = hist_ref[pl.ds(start, SUB), :]
            win = csc - old
        else:
            win = csc

        o_ref[pl.ds(t0, SUB), :] = jnp.clip(win, 0.0, 1.0).astype(o_ref.dtype)
        return csc[SUB - 1:SUB, :]            # new running sum (last row of the cumsum)

    carry0 = carry_ref[pl.ds(0, 1), :]
    carry_out = lax.fori_loop(0, n_chunks, body, carry0, unroll=min(n_chunks, 2))
    carry_ref[pl.ds(0, 1), :] = carry_out

    if has_sub:
        # Keep the last `pad` cumsum rows as history for the next time block.
        @pl.when(t_idx + 1 < pl.num_programs(1))
        def _shift():
            def shift_body(k, c):
                dst = pl.multiple_of(k * SUB, SUB)
                src = pl.multiple_of(TC + k * SUB, SUB)
                hist_ref[pl.ds(dst, SUB), :] = hist_ref[pl.ds(src, SUB), :]
                return c
            # Increasing order is safe even when pad > TC (every source row sits above
            # every destination row that could overwrite it).
            lax.fori_loop(0, pad // SUB, shift_body, 0)


def binary_timed_psp(input_spikes, sigma=0.1, dt=0.001, *, lane_block=None, time_block=None):
    """Pallas implementation of BinaryTimedPSP.forward."""
    # int() matches the torch module (truncation); the max(1, .) guard only changes the
    # sigma < dt case, where the torch module itself is ill-defined (0-length conv kernel).
    duration = max(1, int(sigma / dt))

    T = input_spikes.shape[0]
    trailing = input_spikes.shape[1:]
    F = int(np.prod(trailing)) if trailing else 1
    x2 = input_spikes.reshape(T, F)

    itemsize = jnp.dtype(x2.dtype).itemsize
    row_align = max(SUB, 32 // max(itemsize, 1))     # 8 (f32) / 16 (bf16) / 32 (int8)

    has_sub = duration < T                 # D >= T: the window always covers [0, t]
    pad = _round_up(duration, SUB) if has_sub else 0

    # ---- lane tiling: W <= 512 (vreg-pressure vs HBM-efficiency sweet spot), at least two
    # lane blocks when the feature axis allows it (keeps both v7x cores busy), and the
    # feature axis padded up to a multiple of W (no W collapse for awkward lane counts).
    Fp8 = _round_up(F, LANE)
    if lane_block is None:
        W = min(512, Fp8)
        if Fp8 >= 2 * LANE:
            W = min(W, (Fp8 // 2) // LANE * LANE)
    else:
        W = max(LANE, min(_round_up(lane_block, LANE), Fp8))

    # ---- time tiling: ~512-row blocks so VMEM is O(TC*W) and input/output DMAs pipeline
    # across the innermost ("arbitrary") time axis.
    T8 = _round_up(T, row_align)
    if time_block is None:
        nt = max(1, _cdiv(T8, 512))
    else:
        nt = max(1, _cdiv(T8, _round_up(time_block, row_align)))
    TC = _round_up(_cdiv(T8, nt), row_align)
    T_pad = nt * TC

    # ---- generation-aware VMEM budget ----
    try:
        cap = int(getattr(pltpu.get_tpu_info(), "vmem_capacity_bytes", 64 * 1024 * 1024))
    except Exception:
        cap = 64 * 1024 * 1024             # conservative fallback (v7x-sized)
    budget = (3 * cap) // 4

    def est_bytes(w):
        b = 4 * TC * w * itemsize          # double-buffered input + output blocks
        b += SUB * w * 4                   # carry scratch
        if has_sub:
            b += (pad + TC) * w * 4        # cumsum-history scratch
        return b

    while W > LANE and est_bytes(W) > budget:
        W -= LANE
    # TODO(synk): if est_bytes(LANE) still exceeds the budget (enormous durations), the
    # history itself should be chunked / ring-buffered instead of held whole.

    Fp = _round_up(Fp8, W)
    n_lane = Fp // W
    vmem_limit = int(min(cap * 9 // 10,
                         max(32 * 1024 * 1024, est_bytes(W) + (16 << 20))))

    if (T_pad, Fp) != (T, F):
        x2 = jnp.pad(x2, ((0, T_pad - T), (0, Fp - F)))

    scratch = [pltpu.VMEM((SUB, W), jnp.float32)]
    if has_sub:
        scratch.append(pltpu.VMEM((pad + TC, W), jnp.float32))

    out = pl.pallas_call(
        functools.partial(_psp_kernel, duration=duration, has_sub=has_sub, pad=pad),
        out_shape=jax.ShapeDtypeStruct((T_pad, Fp), x2.dtype),
        grid=(n_lane, nt),
        in_specs=[pl.BlockSpec((TC, W), lambda i, t: (t, i))],
        out_specs=pl.BlockSpec((TC, W), lambda i, t: (t, i)),
        scratch_shapes=scratch,
        compiler_params=pltpu.CompilerParams(
            dimension_semantics=("parallel", "arbitrary"),
            vmem_limit_bytes=vmem_limit),
    )(x2)

    if (T_pad, Fp) != (T, F):
        out = out[:T, :F]
    return out.reshape((T,) + trailing)


def _reference(input_spikes, sigma=0.1, dt=0.001):
    """Pure-JAX reference mirroring the torch conv1d formulation."""
    duration = max(1, int(sigma / dt))
    T = input_spikes.shape[0]
    x = input_spikes.astype(jnp.float32)
    cs = jnp.cumsum(x, axis=0)
    cs_pad = jnp.concatenate([jnp.zeros_like(cs[:1]), cs], axis=0)   # cs_pad[j] = sum of first j
    t = jnp.arange(T)
    lo = jnp.maximum(t - duration + 1, 0)
    window = cs_pad[t + 1] - cs_pad[lo]
    return jnp.clip(window, 0.0, 1.0).astype(input_spikes.dtype)


if __name__ == "__main__":
    key = jax.random.PRNGKey(0)

    # Primary example: (time=16, batch=2, neurons=32), default module params
    # sigma=0.1, dt=0.001 -> duration=100 >= T (fast path, single time/lane block).
    T, B, N = 16, 2, 32
    spikes = jax.random.bernoulli(key, 0.3, (T, B, N)).astype(jnp.float32)
    out = jax.block_until_ready(binary_timed_psp(spikes, sigma=0.1, dt=0.001))
    assert out.shape == spikes.shape and out.dtype == spikes.dtype
    np.testing.assert_allclose(np.asarray(out),
                               np.asarray(_reference(spikes, 0.1, 0.001)), atol=1e-6)

    # Short windows (duration < T): cumsum-difference path within one time block,
    # including old-row reads that cross the 8-row chunk boundary.
    for sigma in (0.002, 0.005):
        o = jax.block_until_ready(binary_timed_psp(spikes, sigma=sigma, dt=0.001))
        np.testing.assert_allclose(np.asarray(o),
                                   np.asarray(_reference(spikes, sigma, 0.001)), atol=1e-6)

    # Ragged shapes: T not a multiple of 8, features not a multiple of 128.
    spikes2 = jax.random.bernoulli(jax.random.PRNGKey(0), 0.25, (13, 3, 21)).astype(jnp.float32)
    o2 = jax.block_until_ready(binary_timed_psp(spikes2, sigma=0.004, dt=0.001))
    np.testing.assert_allclose(np.asarray(o2),
                               np.asarray(_reference(spikes2, 0.004, 0.001)), atol=1e-6)

    # Multiple time blocks (carry + history shift across grid steps): windows that are not
    # multiples of 8, a window longer than a time block (overlapping history shift), a
    # fast-path run spanning several time blocks, and two lane blocks with lane padding.
    spikes3 = jax.random.bernoulli(jax.random.PRNGKey(0), 0.2, (40, 2, 100)).astype(jnp.float32)
    for sigma_d in (5.0, 12.0, 20.0, 100.0):
        o3 = jax.block_until_ready(
            binary_timed_psp(spikes3, sigma=sigma_d, dt=1.0, time_block=16, lane_block=128))
        np.testing.assert_allclose(np.asarray(o3),
                                   np.asarray(_reference(spikes3, sigma_d, 1.0)), atol=1e-6)

    print("KERNEL_OK")
</pallas_src>

<mosaic_0001>
module attributes {stable_mosaic.version = 11 : i64} {
  func.func @_psp_kernel(%arg0: i32, %arg1: i32, %arg2: memref<16x128xf32, #tpu.memory_space<vmem>>, %arg3: memref<16x128xf32, #tpu.memory_space<vmem>>, %arg4: memref<8x128xf32, #tpu.memory_space<vmem>>) attributes {dimension_semantics = [#tpu.dimension_semantics<parallel>, #tpu.dimension_semantics<arbitrary>], iteration_bounds = array<i64: 1, 1>, scalar_prefetch = 0 : i64, scratch_operands = 1 : i64, tpu.core_type = #tpu.core_type<tc>, window_params = [{transform_indices = @transform_0, window_bounds = array<i64: 16, 128>}, {transform_indices = @transform_1, window_bounds = array<i64: 16, 128>}]} {
    %c0_i32 = arith.constant 0 : i32
    %0 = arith.cmpi eq, %arg1, %c0_i32 : i32
    %1 = arith.extui %0 : i1 to i32
    %c0_i32_0 = arith.constant 0 : i32
    %2 = arith.cmpi ne, %1, %c0_i32_0 : i32
    scf.if %2 {
      %cst_30 = arith.constant 0.000000e+00 : f32
      %68 = vector.broadcast %cst_30 : f32 to vector<8x128xf32>
      %c0_31 = arith.constant 0 : index
      %c0_32 = arith.constant 0 : index
      %69 = vector.load %arg4[%c0_31, %c0_32] : memref<8x128xf32, #tpu.memory_space<vmem>>, vector<8x128xf32>
      tpu.vector_store %arg4[%c0_31, %c0_32], %68 {strides = array<i32>} : memref<8x128xf32, #tpu.memory_space<vmem>>, vector<8x128xf32>,
    } else {
    }
    %3 = tpu.iota {dimensions = array<i32: 0>} : vector<8x128xi32>
    %c0 = arith.constant 0 : index
    %c0_1 = arith.constant 0 : index
    %4 = vector.load %arg4[%c0, %c0_1] : memref<8x128xf32, #tpu.memory_space<vmem>>, vector<1x128xf32>
    %c0_i32_2 = arith.constant 0 : i32
    %c8_i32 = arith.constant 8 : i32
    %5 = arith.muli %c0_i32_2, %c8_i32 : i32
    %6 = tpu.assume_multiple %5, 8 : i32
    %7 = arith.index_cast %6 : i32 to index
    %c0_3 = arith.constant 0 : index
    %8 = vector.load %arg2[%7, %c0_3] : memref<16x128xf32, #tpu.memory_space<vmem>>, vector<8x128xf32>
    %c1_i32 = arith.constant 1 : i32
    %9 = vector.broadcast %c1_i32 : i32 to vector<8x128xi32>
    %10 = arith.cmpi sge, %3, %9 : vector<8x128xi32>
    %c1_i32_4 = arith.constant 1 : i32
    %11 = tpu.dynamic_rotate %8 by %c1_i32_4 dim 0 : vector<8x128xf32>, i32 -> vector<8x128xf32>
    %cst = arith.constant 0.000000e+00 : f32
    %12 = vector.broadcast %cst : f32 to vector<8x128xf32>
    %13 = arith.select %10, %11, %12 : vector<8x128xi1>, vector<8x128xf32>
    %14 = arith.addf %8, %13 : vector<8x128xf32>
    %c2_i32 = arith.constant 2 : i32
    %15 = vector.broadcast %c2_i32 : i32 to vector<8x128xi32>
    %16 = arith.cmpi sge, %3, %15 : vector<8x128xi32>
    %c2_i32_5 = arith.constant 2 : i32
    %17 = tpu.dynamic_rotate %14 by %c2_i32_5 dim 0 : vector<8x128xf32>, i32 -> vector<8x128xf32>
    %cst_6 = arith.constant 0.000000e+00 : f32
    %18 = vector.broadcast %cst_6 : f32 to vector<8x128xf32>
    %19 = arith.select %16, %17, %18 : vector<8x128xi1>, vector<8x128xf32>
    %20 = arith.addf %14, %19 : vector<8x128xf32>
    %c4_i32 = arith.constant 4 : i32
    %21 = vector.broadcast %c4_i32 : i32 to vector<8x128xi32>
    %22 = arith.cmpi sge, %3, %21 : vector<8x128xi32>
    %c4_i32_7 = arith.constant 4 : i32
    %23 = tpu.dynamic_rotate %20 by %c4_i32_7 dim 0 : vector<8x128xf32>, i32 -> vector<8x128xf32>
    %cst_8 = arith.constant 0.000000e+00 : f32
    %24 = vector.broadcast %cst_8 : f32 to vector<8x128xf32>
    %25 = arith.select %22, %23, %24 : vector<8x128xi1>, vector<8x128xf32>
    %26 = arith.addf %20, %25 : vector<8x128xf32>
    %27 = vector.broadcast %4 : vector<1x128xf32> to vector<8x128xf32>
    %28 = arith.addf %26, %27 : vector<8x128xf32>
    %cst_9 = arith.constant 0.000000e+00 : f32
    %cst_10 = arith.constant 1.000000e+00 : f32
    %29 = vector.broadcast %cst_9 : f32 to vector<8x128xf32>
    %30 = arith.maximumf %29, %28 : vector<8x128xf32>
    %31 = vector.broadcast %cst_10 : f32 to vector<8x128xf32>
    %32 = arith.minimumf %31, %30 : vector<8x128xf32>
    %33 = arith.index_cast %6 : i32 to index
    %c0_11 = arith.constant 0 : index
    %34 = vector.load %arg3[%33, %c0_11] : memref<16x128xf32, #tpu.memory_space<vmem>>, vector<8x128xf32>
    tpu.vector_store %arg3[%33, %c0_11], %32 {strides = array<i32>} : memref<16x128xf32, #tpu.memory_space<vmem>>, vector<8x128xf32>,
    %35 = vector.extract_strided_slice %28 {offsets = [7, 0], sizes = [1, 128], strides = [1, 1]} : vector<8x128xf32> to vector<1x128xf32>
    %c1_i32_12 = arith.constant 1 : i32
    %c8_i32_13 = arith.constant 8 : i32
    %36 = arith.muli %c1_i32_12, %c8_i32_13 : i32
    %37 = tpu.assume_multiple %36, 8 : i32
    %38 = arith.index_cast %37 : i32 to index
    %c0_14 = arith.constant 0 : index
    %39 = vector.load %arg2[%38, %c0_14] : memref<16x128xf32, #tpu.memory_space<vmem>>, vector<8x128xf32>
    %c1_i32_15 = arith.constant 1 : i32
    %40 = vector.broadcast %c1_i32_15 : i32 to vector<8x128xi32>
    %41 = arith.cmpi sge, %3, %40 : vector<8x128xi32>
    %c1_i32_16 = arith.constant 1 : i32
    %42 = tpu.dynamic_rotate %39 by %c1_i32_16 dim 0 : vector<8x128xf32>, i32 -> vector<8x128xf32>
    %cst_17 = arith.constant 0.000000e+00 : f32
    %43 = vector.broadcast %cst_17 : f32 to vector<8x128xf32>
    %44 = arith.select %41, %42, %43 : vector<8x128xi1>, vector<8x128xf32>
    %45 = arith.addf %39, %44 : vector<8x128xf32>
    %c2_i32_18 = arith.constant 2 : i32
    %46 = vector.broadcast %c2_i32_18 : i32 to vector<8x128xi32>
    %47 = arith.cmpi sge, %3, %46 : vector<8x128xi32>
    %c2_i32_19 = arith.constant 2 : i32
    %48 = tpu.dynamic_rotate %45 by %c2_i32_19 dim 0 : vector<8x128xf32>, i32 -> vector<8x128xf32>
    %cst_20 = arith.constant 0.000000e+00 : f32
    %49 = vector.broadcast %cst_20 : f32 to vector<8x128xf32>
    %50 = arith.select %47, %48, %49 : vector<8x128xi1>, vector<8x128xf32>
    %51 = arith.addf %45, %50 : vector<8x128xf32>
    %c4_i32_21 = arith.constant 4 : i32
    %52 = vector.broadcast %c4_i32_21 : i32 to vector<8x128xi32>
    %53 = arith.cmpi sge, %3, %52 : vector<8x128xi32>
    %c4_i32_22 = arith.constant 4 : i32
    %54 = tpu.dynamic_rotate %51 by %c4_i32_22 dim 0 : vector<8x128xf32>, i32 -> vector<8x128xf32>
    %cst_23 = arith.constant 0.000000e+00 : f32
    %55 = vector.broadcast %cst_23 : f32 to vector<8x128xf32>
    %56 = arith.select %53, %54, %55 : vector<8x128xi1>, vector<8x128xf32>
    %57 = arith.addf %51, %56 : vector<8x128xf32>
    %58 = vector.broadcast %35 : vector<1x128xf32> to vector<8x128xf32>
    %59 = arith.addf %57, %58 : vector<8x128xf32>
    %cst_24 = arith.constant 0.000000e+00 : f32
    %cst_25 = arith.constant 1.000000e+00 : f32
    %60 = vector.broadcast %cst_24 : f32 to vector<8x128xf32>
    %61 = arith.maximumf %60, %59 : vector<8x128xf32>
    %62 = vector.broadcast %cst_25 : f32 to vector<8x128xf32>
    %63 = arith.minimumf %62, %61 : vector<8x128xf32>
    %64 = arith.index_cast %37 : i32 to index
    %c0_26 = arith.constant 0 : index
    %65 = vector.load %arg3[%64, %c0_26] : memref<16x128xf32, #tpu.memory_space<vmem>>, vector<8x128xf32>
    tpu.vector_store %arg3[%64, %c0_26], %63 {strides = array<i32>} : memref<16x128xf32, #tpu.memory_space<vmem>>, vector<8x128xf32>,
    %66 = vector.extract_strided_slice %59 {offsets = [7, 0], sizes = [1, 128], strides = [1, 1]} : vector<8x128xf32> to vector<1x128xf32>
    %c2_i32_27 = arith.constant 2 : i32
    %c0_28 = arith.constant 0 : index
    %c0_29 = arith.constant 0 : index
    %67 = vector.load %arg4[%c0_28, %c0_29] : memref<8x128xf32, #tpu.memory_space<vmem>>, vector<1x128xf32>
    tpu.vector_store %arg4[%c0_28, %c0_29], %66 {strides = array<i32>} : memref<8x128xf32, #tpu.memory_space<vmem>>, vector<1x128xf32>,
    return
  }
  func.func @transform_0(%arg0: i32, %arg1: i32) -> (i32, i32) {
    %c0_i32 = arith.constant 0 : i32
    return %arg1, %arg0 : i32, i32
  }
  func.func @transform_1(%arg0: i32, %arg1: i32) -> (i32, i32) {
    %c0_i32 = arith.constant 0 : i32
    return %arg1, %arg0 : i32, i32
  }
}

</mosaic_0001>

<bundles_post_ra>
// kernel: tpu_custom_call.1
= control target key start
LH: loop header
LB: loop body
LE: loop exit
PB: predicated region body
PF: predicated region fallthrough
CT: control target
= control target key end

     0   :  { %6 = vsyncpa [#allocation4], 0  ;;  %s189_s0 = inlined_call_operand.hbm [shape: f32[16,128], index: 0, kind: input, shape index: {}]   ;;  %s190_s1 = inlined_call_operand.hbm [shape: f32[16,128], index: 1, kind: output, shape index: {}]  }
   0x1   :  { %7 = vsyncpa [#allocation5], 0  ;;  %s144_s6 = smov [#allocation3]   ;;  %s96_s10 = scalar_lea.hbm %s189_s0, 256 }
   0x2   :  { %s13_s7 = sshll.u32 %s144_s6, 4  ;;  %p97_p0 = scmp.ne.s32.totalorder %s189_s0, %s96_s10  ;;  %s14_s7 = int_to_ptr.vmem [resolvable:$true] %s13_s7 }
   0x3   :  { %p100_p1 = scmp.lt.u32.totalorder %s96_s10, %s189_s0 }
   0x5   :  { %p102_p2 = pnand %p100_p1, %p97_p0 }
   0x7   :  { %105 = shalt.err (!%p102_p2)
}
   0x8   :  { %s106_s15 = scalar_lea.vmem %s14_s7, 256  ;;  %p111_p4 = scmp.lt.s32.totalorder %s14_s7, %s14_s7 }
   0x9   :  { %p107_p3 = scmp.ne.s32.totalorder %s14_s7, %s106_s15  ;;  %p112_p5 = scmp.lt.s32.totalorder %s106_s15, %s106_s15 }
   0xb   :  { %p113_p6 = por %p112_p5, %p111_p4 }
   0xd   :  { %p114_p7 = pnand %p113_p6, %p107_p3 }
   0xf   :  { %117 = shalt.err (!%p114_p7)
}
  0x10   :  { %s145_s16 = smov 128   ;;  %s146_s17 = smov 8  }
  0x11   :  { %19 = dma.hbm_to_vmem [thread:$0]  %s189_s0, 256, %s14_s7, [#allocation4], %s145_s16, %s145_s16, %s146_s17  }
  0x12   :  { %140 = dma.done.wait [#allocation4], 256  }
  0x13   :  { %141 = vsyncadd [#allocation4], 4294967040  ;;  %v28_v0 = vlaneseq  ;;  %v147_v1 = vmov 0.0   ;;  %v31_v3 = vld [vmem:[#allocation3] sm:$0xff]  ;;  %v53_v4 = vld [vmem:[#allocation3 + $0x8] sm:$0xff]  ;;  %s148_s0 = smov [#allocation6]  }
  0x14   :  { %27 = vst [vmem:[#allocation2] sm:$0xff] %v147_v1  ;;  %v33_v5 = vrot.slane %v31_v3, 7  ;;  %v54_v6 = vrot.slane %v53_v4, 7  ;;  %s78_s20 = sshll.u32 %s148_s0, 4  ;;  %s79_s20 = int_to_ptr.vmem [resolvable:$true] %s78_s20 }
  0x15   :  { %v29_v2 = vshrl.u32 %v28_v0, 7  ;;  %s118_s21 = scalar_lea.vmem %s79_s20, 256  ;;  %p123_p9 = scmp.lt.s32.totalorder %s79_s20, %s79_s20 }
  0x16   :  { %p119_p8 = scmp.ne.s32.totalorder %s79_s20, %s118_s21  ;;  %p124_p10 = scmp.lt.s32.totalorder %s118_s21, %s118_s21 }
  0x17   :  { %vm32_vm0 = vcmp.ge.s32.totalorder %v29_v2, 1  ;;  %vm36_vm1 = vcmp.ge.s32.totalorder %v29_v2, 2  ;;  %vm40_vm2 = vcmp.ge.s32.totalorder %v29_v2, 4  ;;  %v65_v23 = vsub.s32 7, %v29_v2 }
  0x18   :  { %v34_v7 = vsel %vm32_vm0, %v33_v5, 0.0  ;;  %v55_v8 = vsel %vm32_vm0, %v54_v6, 0.0  ;;  %p125_p11 = por %p124_p10, %p123_p9 }
  0x19   :  { %v35_v9 = vadd.f32 %v34_v7, %v31_v3  ;;  %v56_v10 = vadd.f32 %v55_v8, %v53_v4 }
  0x1a   :  { %p126_p12 = pnand %p125_p11, %p119_p8 }
  0x1b   :  { %v37_v11 = vrot.slane %v35_v9, 6  ;;  %v57_v12 = vrot.slane %v56_v10, 6  ;;  %v90_v19 = vld [vmem:[#allocation2] ss:$0 sm:$0xff] }
  0x1d   :  { %v38_v13 = vsel %vm36_vm1, %v37_v11, 0.0  ;;  %v58_v14 = vsel %vm36_vm1, %v57_v12, 0.0 }
  0x1e   :  { %v39_v15 = vadd.f32 %v38_v13, %v35_v9  ;;  %v59_v16 = vadd.f32 %v58_v14, %v56_v10 }
  0x20   :  { %v41_v17 = vrot.slane %v39_v15, 4  ;;  %v60_v18 = vrot.slane %v59_v16, 4 }
  0x22   :  { %v42_v20 = vsel %vm40_vm2, %v41_v17, 0.0  ;;  %v61_v21 = vsel %vm40_vm2, %v60_v18, 0.0 }
  0x23   :  { %v43_v22 = vadd.f32 %v42_v20, %v39_v15  ;;  %v62_v25 = vadd.f32 %v61_v21, %v59_v16 }
  0x25   :  { %v48_v24 = vadd.f32 %v90_v19, %v43_v22 }
  0x27   :  { %v49_v26 = vmax.f32 %v48_v24, 0.0  ;;  %v66_v27 = vrot.slane %v48_v24, %v65_v23 }
  0x29   :  { %v50_v28 = vmin.f32 %v49_v26, 1.0  ;;  %v67_v29 = vadd.f32 %v66_v27, %v62_v25 }
  0x2b   :  { %51 = vst [vmem:[#allocation6] sm:$0xff] %v50_v28  ;;  %72 = vst [vmem:[#allocation2 - $0x7] sm:$0x80] %v67_v29  ;;  %v68_v30 = vmax.f32 %v67_v29, 0.0 }
  0x2d   :  { %v69_v31 = vmin.f32 %v68_v30, 1.0 }
  0x2f   :  { %71 = vst [vmem:[#allocation6 + $0x8] sm:$0xff] %v69_v31 }
  0x30   :  { %129 = shalt.err (!%p126_p12)
}
  0x31   :  { %s130_s24 = scalar_lea.hbm %s190_s1, 256 }
  0x32   :  { %p131_p13 = scmp.ne.s32.totalorder %s190_s1, %s130_s24  ;;  %p134_p0 = scmp.lt.u32.totalorder %s130_s24, %s190_s1 }
  0x34   :  { %p136_p1 = pnand %p134_p0, %p131_p13 }
  0x36   :  { %139 = shalt.err (!%p136_p1)
}
  0x37   :  { %84 = dma.vmem_to_hbm [thread:$0]  %s79_s20, 256, %s190_s1, [#allocation5], %s145_s16, %s145_s16, %s146_s17  }
  0x38   :  { %142 = dma.done.wait [#allocation5], 256  }
  0x39   :  { %143 = vsyncadd [#allocation5], 4294967040 }
  0x3a   :  { %88 = vsyncpa [#allocation4], 1 }
  0x3b   :  { %89 = vsyncpa [#allocation5], 1 }

</bundles_post_ra>
